<compile_context>
chip_gen: v6e
topology: v6e:2x2x1
jax: 0.10.0
libtpu: 0.0.40
codegen_flags: <defaults>
</compile_context>

<pallas_src>
from functools import partial

import numpy as np

import jax
import jax.numpy as jnp
from jax.experimental import pallas as pl
from jax.experimental.pallas import tpu as pltpu


_TARGET_STEPS = 8            # >= 4 grid steps per TC on dual-TC parts -> pipelined DMAs
_MIN_BLOCK_BYTES = 1 << 20   # ~1 MiB blocks reach ~85% of the HBM roofline

_VMEM_CAPS = None


def _vmem_caps():
    """(budget, scoped_limit) in bytes, derived from the chip's physical VMEM.

    ~36/48 MiB on 64-MiB parts (v7x), ~72/96 MiB on 128-MiB parts (v5e/v6e)."""
    global _VMEM_CAPS
    if _VMEM_CAPS is None:
        try:
            phys = int(pltpu.get_tpu_info().vmem_capacity_bytes)
        except Exception:
            phys = 64 * 1024 * 1024              # conservative fallback (v7x-sized)
        _VMEM_CAPS = ((phys * 9) // 16, (phys * 3) // 4)
    return _VMEM_CAPS


def _round_up(x, m):
    return (x + m - 1) // m * m


def _align_down(x, m):
    return max(x // m * m, m)


def _largest_divisor_leq(n, cap):
    cap = max(min(cap, n), 1)
    for d in range(cap, 0, -1):
        if n % d == 0:
            return d
    return 1


# ---------------------------------------------------------------------------
# Fast path: frozen bilinear-diagonal weights (even = x, odd = 0.5*(x + x_next))
# ---------------------------------------------------------------------------
def _bilinear_fast_kernel(x_ref, xl_ref, o_ref):
    # x_ref: (bc, Tb, S1, S2)   xl_ref: (bc, 1, S1, S2)   o_ref: (bc, Tb, 2, S1, S2)
    tb = x_ref.shape[1]
    x = x_ref[...]
    half = jnp.asarray(0.5, dtype=x.dtype)

    # even rows: out[2i] == x[i] -> straight copy, no cast, no temporaries
    o_ref[:, :, 0] = x

    # odd rows inside this time block: 0.5 * (x[i] + x[i+1]); time is a major axis,
    # so the shift is just a cheap block offset (no lane/sublane work).
    # TODO(synk): on v5e (no bf16 VALU) a bf16 input could upcast this add to f32.
    if tb > 1:
        o_ref[:, :tb - 1, 1] = half * (x[:, :tb - 1] + x[:, 1:])

    # last odd row of the block pairs with the next block's first row
    # (zero at the clip end: the transposed conv sees x[T] == 0).
    nxt = xl_ref[...]                                        # (bc, 1, S1, S2)
    is_last = pl.program_id(1) == pl.num_programs(1) - 1
    nxt = jnp.where(is_last, jnp.zeros_like(nxt), nxt)
    o_ref[:, tb - 1:tb, 1] = half * (x[:, tb - 1:tb] + nxt)


def _pick_fast_tiles(bc, t, s1, s2, dtype):
    esize = jnp.dtype(dtype).itemsize
    budget, _ = _vmem_caps()
    s_pad = _round_up(s1, 8) * _round_up(s2, 128)
    # per (bc row, time step) VMEM: input block 2x + output block 2x2 + ~2 temporaries
    per_cell = 8 * s_pad * esize
    # largest time block (divisor of t) s.t. a single bc row stays well under budget
    tb = _largest_divisor_leq(t, max(budget // (2 * per_cell), 1))
    t_blocks = t // tb
    cap = max(budget // (per_cell * tb), 1)
    hbm_per_row = 3 * tb * s1 * s2 * esize                   # 1x read + 2x write
    want_steps = max(_TARGET_STEPS // t_blocks, 1)
    want = max(pl.cdiv(bc, want_steps),
               pl.cdiv(_MIN_BLOCK_BYTES, max(hbm_per_row, 1)))
    bc_blk = max(min(cap, want, bc), 1)
    return bc_blk, tb


@partial(jax.jit, static_argnames=("time_block",))
def _temporal_upsample_bilinear(x, *, time_block=None):
    b, c, t, h, w = x.shape
    hw = h * w
    hw_pad = _round_up(hw, 128)
    x3 = x.reshape(b * c, t, hw)                             # free reshape, no transpose
    if hw_pad != hw:
        # lane-dense fallback: pad the spatial plane once instead of paying a
        # masked vst on every row inside the kernel.
        x3 = jnp.pad(x3, ((0, 0), (0, 0), (0, hw_pad - hw)))
    s1, s2 = hw_pad // 128, 128
    x4 = x3.reshape(b * c, t, s1, s2)

    bc_blk, tb = _pick_fast_tiles(b * c, t, s1, s2, x.dtype)
    if time_block is not None:                               # test / override hook
        tb = _largest_divisor_leq(t, time_block)
    grid = (pl.cdiv(b * c, bc_blk), t // tb)

    def look_map(i, j):
        return (i, jnp.minimum((j + 1) * tb, t - 1), 0, 0)

    out = pl.pallas_call(
        _bilinear_fast_kernel,
        out_shape=jax.ShapeDtypeStruct((b * c, t, 2, s1, s2), x.dtype),
        grid_spec=pltpu.PrefetchScalarGridSpec(
            num_scalar_prefetch=0,
            grid=grid,
            in_specs=[
                pl.BlockSpec((bc_blk, tb, s1, s2), lambda i, j: (i, j, 0, 0)),
                pl.BlockSpec((bc_blk, 1, s1, s2), look_map),
            ],
            out_specs=pl.BlockSpec((bc_blk, tb, 2, s1, s2),
                                   lambda i, j: (i, j, 0, 0, 0)),
        ),
        compiler_params=pltpu.CompilerParams(
            dimension_semantics=("parallel", "parallel"),
            vmem_limit_bytes=_vmem_caps()[1]),
    )(x4, x4)

    out = out.reshape(b, c, 2 * t, hw_pad)
    if hw_pad != hw:
        out = out[..., :hw]
    return out.reshape(b, c, 2 * t, h, w)                    # free reshape back


# ---------------------------------------------------------------------------
# General path: arbitrary (learned) ConvTranspose1d weights, MXU matmuls
# ---------------------------------------------------------------------------
def _general_kernel(x_ref, xl_ref, w_ref, b_ref, o_ref):
    # x_ref: (Tb, n, C)   xl_ref: (1, n, C)   w_ref: (C, 3C) = [W1 | W2 | W0]
    # b_ref: (1, C) f32   o_ref: (2*Tb, n, C)
    tb, n, c = x_ref.shape
    wcat = w_ref[...]                                        # x dtype -> fast MXU path
    bias = jnp.broadcast_to(b_ref[...], (n, c))              # hoisted (not CSE'd in loops)

    carry = None
    for j in range(tb):                                      # bounded unroll (Tb <= 8)
        y = jnp.dot(x_ref[j], wcat, preferred_element_type=jnp.float32)   # (n, 3C)
        o_ref[2 * j] = (y[:, :c] + bias).astype(o_ref.dtype)              # even row
        if j > 0:
            o_ref[2 * j - 1] = (carry + y[:, 2 * c:]).astype(o_ref.dtype) # odd row
        carry = y[:, c:2 * c] + bias
    # final odd row of the block: W0 tap on the next block's first time step
    # (zero at the clip end).
    nterm = jnp.dot(xl_ref[0], wcat[:, 2 * c:], preferred_element_type=jnp.float32)
    has_next = pl.program_id(1) < pl.num_programs(1) - 1
    nterm = jnp.where(has_next, nterm, jnp.zeros_like(nterm))
    o_ref[2 * tb - 1] = (carry + nterm).astype(o_ref.dtype)


def _pick_general_tiles(n, t, c, dtype):
    ex = jnp.dtype(dtype).itemsize
    budget, _ = _vmem_caps()
    tb = _largest_divisor_leq(t, 8)                          # grid covers the rest of T
    t_blocks = t // tb
    c_lane = _round_up(c, 128)
    # grid-invariant weight/bias blocks (double-buffered by the pipeline)
    w_bytes = 2 * _round_up(c, 8) * _round_up(3 * c, 128) * ex + 2 * 8 * c_lane * 4
    # per n-row: x block 2x + lookahead 2x + out block 2x(2*Tb) + f32 temporaries
    per_row = (2 * tb + 2 + 4 * tb) * c_lane * ex + 6 * c_lane * 4
    avail = max(budget - w_bytes, 1 << 20)
    cap = max(avail // max(per_row, 1), 8)
    want_steps = max(_TARGET_STEPS // t_blocks, 1)
    want = max(pl.cdiv(n, want_steps), min(n, 256))          # MXU-friendly M when n allows
    tile = min(cap, want, n)
    if n >= 256 and tile >= 256:
        tile = _align_down(tile, 256)
    elif n >= 128 and tile >= 128:
        tile = _align_down(tile, 128)
    elif n >= 8:
        tile = _align_down(max(tile, 8), 8)
    else:
        tile = n
    return max(tile, 1), tb


@jax.jit
def _temporal_upsample_general(x, weight, bias):
    b, c, t, h, w = x.shape
    n = b * h * w
    # TODO(synk): this path still pays two wrapper transposes to reach a
    # channels-last layout; a transpose-free NCTHW kernel needs c on the
    # contracting/sublane axis, which the (8,128) trailing-tile rule makes
    # awkward -- keep the surrounding model channels-last to avoid the traffic.
    x_tnc = jnp.transpose(x, (2, 0, 3, 4, 1)).reshape(t, n, c)           # (T, N, C)
    # fuse the three taps into one MXU RHS, in the activation dtype
    wcat = jnp.concatenate([weight[1], weight[2], weight[0]], axis=-1).astype(x.dtype)
    bias2d = bias.astype(jnp.float32).reshape(1, c)

    n_tile, tb = _pick_general_tiles(n, t, c, x.dtype)
    grid = (pl.cdiv(n, n_tile), t // tb)

    def look_map(i, j):
        return (jnp.minimum((j + 1) * tb, t - 1), i, 0)

    out = pl.pallas_call(
        _general_kernel,
        out_shape=jax.ShapeDtypeStruct((2 * t, n, c), x.dtype),
        grid_spec=pltpu.PrefetchScalarGridSpec(
            num_scalar_prefetch=0,
            grid=grid,
            in_specs=[
                pl.BlockSpec((tb, n_tile, c), lambda i, j: (j, i, 0)),
                pl.BlockSpec((1, n_tile, c), look_map),
                # grid-invariant blocks: the pipeline skips the re-fetch, only the
                # (accounted) double-buffer VMEM is paid.
                pl.BlockSpec((c, 3 * c), lambda i, j: (0, 0)),
                pl.BlockSpec((1, c), lambda i, j: (0, 0)),
            ],
            out_specs=pl.BlockSpec((2 * tb, n_tile, c), lambda i, j: (j, i, 0)),
        ),
        compiler_params=pltpu.CompilerParams(
            dimension_semantics=("parallel", "parallel"),
            vmem_limit_bytes=_vmem_caps()[1]),
    )(x_tnc, x_tnc, wcat, bias2d)

    out = out.reshape(2 * t, b, h, w, c)
    return jnp.transpose(out, (1, 4, 0, 2, 3))               # (b, C, 2T, h, w)


# ---------------------------------------------------------------------------
# Dispatch + parameter construction
# ---------------------------------------------------------------------------
def is_bilinear_params(weight, bias):
    """Host-side check that (weight, bias) are exactly the frozen bilinear init.
    Only valid on concrete arrays -- call once at parameter-load time."""
    w = np.asarray(jax.device_get(weight))
    b_ = np.asarray(jax.device_get(bias))
    if w.ndim != 3 or w.shape[0] != 3 or w.shape[1] != w.shape[2]:
        return False
    c = w.shape[1]
    ref = (np.asarray([0.5, 1.0, 0.5], dtype=w.dtype)[:, None, None]
           * np.eye(c, dtype=w.dtype))
    return bool(np.array_equal(w, ref) and not np.any(b_))


def temporal_upsample(x, weight, bias, *, bilinear=None):
    """TemporalUpsample forward. x: (b, c, t, h, w); weight: (3, C, C) laid out as
    (tap, c_in, c_out); bias: (C,).

    `bilinear` selects the transpose-free VPU fast path (True) vs the general MXU
    path (False). Decide it ONCE at parameter-load time (e.g. via
    `is_bilinear_params`) and pass it explicitly to avoid a per-call host sync;
    when left as None it is auto-detected on the host (traced params fall back to
    the general path)."""
    if bilinear is None:
        try:
            bilinear = is_bilinear_params(weight, bias)
        except Exception:                 # traced params (under jit/vmap)
            bilinear = False
    if bilinear:
        return _temporal_upsample_bilinear(x)
    return _temporal_upsample_general(x, weight, bias)


def make_params(dim, dtype=jnp.float32):
    """Deterministic init matching init_bilinear_kernel_1d_: zeros everywhere,
    diag channels get [0.5, 1.0, 0.5], bias zeros.  Layout (tap, c_in, c_out)."""
    bilinear = jnp.asarray([0.5, 1.0, 0.5], dtype)
    eye = jnp.eye(dim, dtype=dtype)
    weight = bilinear[:, None, None] * eye[None, :, :]
    bias = jnp.zeros((dim,), dtype)
    return weight, bias


def _reference(x, weight, bias):
    """Plain-JAX reference of ConvTranspose1d(k=3, s=2, p=1, output_padding=1) over time."""
    b, c, t, h, w = x.shape
    bb = bias[None, :, None, None, None]
    ein = lambda xx, ww: jnp.einsum('bcthw,cd->bdthw', xx, ww)
    x_next = jnp.concatenate(
        [x[:, :, 1:], jnp.zeros((b, c, 1, h, w), x.dtype)], axis=2)
    even = ein(x, weight[1]) + bb
    odd = ein(x, weight[2]) + ein(x_next, weight[0]) + bb
    return jnp.stack([even, odd], axis=3).reshape(b, c, 2 * t, h, w)


if __name__ == "__main__":
    key = jax.random.PRNGKey(0)
    kx, kw, kb, kx2 = jax.random.split(key, 4)

    # case 1: h*w not a multiple of 128 (exercises the lane-dense padding fallback)
    b, c, t, h, w = 2, 4, 8, 8, 8
    x = jax.random.normal(kx, (b, c, t, h, w), dtype=jnp.float32)

    weight, bias = make_params(c)
    ref_fast = _reference(x, weight, bias)

    # 1a) frozen bilinear init -> transpose-free VPU fast path (static flag)
    out_fast = jax.block_until_ready(temporal_upsample(x, weight, bias, bilinear=True))
    assert out_fast.shape == (b, c, 2 * t, h, w), out_fast.shape
    assert jnp.allclose(out_fast, ref_fast, atol=1e-5, rtol=1e-5)

    # 1b) same path with forced time tiling (exercises the cross-block odd row)
    out_fast_tt = jax.block_until_ready(_temporal_upsample_bilinear(x, time_block=4))
    assert jnp.allclose(out_fast_tt, ref_fast, atol=1e-5, rtol=1e-5)

    # 1c) general MXU path on the frozen params must agree as well
    out_gen_frozen = jax.block_until_ready(
        temporal_upsample(x, weight, bias, bilinear=False))
    assert jnp.allclose(out_gen_frozen, ref_fast, atol=1e-4, rtol=1e-4)

    # 1d) arbitrary (trained) weights -> general MXU path (auto-detected on host)
    weight2 = 0.1 * jax.random.normal(kw, (3, c, c), dtype=jnp.float32)
    bias2 = 0.1 * jax.random.normal(kb, (c,), dtype=jnp.float32)
    out_gen = jax.block_until_ready(temporal_upsample(x, weight2, bias2))
    assert out_gen.shape == (b, c, 2 * t, h, w), out_gen.shape
    assert jnp.allclose(out_gen, _reference(x, weight2, bias2), atol=1e-4, rtol=1e-4)

    # case 2: lane-aligned spatial plane + multiple time blocks in the general path
    b2, c2, t2, h2, w2 = 1, 8, 12, 16, 8           # h*w == 128; t=12 -> Tb=6, 2 blocks
    x2 = jax.random.normal(kx2, (b2, c2, t2, h2, w2), dtype=jnp.float32)
    wgt2, bs2 = make_params(c2)
    ref2 = _reference(x2, wgt2, bs2)
    out2_fast = jax.block_until_ready(temporal_upsample(x2, wgt2, bs2, bilinear=True))
    assert jnp.allclose(out2_fast, ref2, atol=1e-5, rtol=1e-5)
    wgt2b = 0.1 * jax.random.normal(kw, (3, c2, c2), dtype=jnp.float32)
    bs2b = 0.1 * jax.random.normal(kb, (c2,), dtype=jnp.float32)
    out2_gen = jax.block_until_ready(temporal_upsample(x2, wgt2b, bs2b, bilinear=False))
    assert jnp.allclose(out2_gen, _reference(x2, wgt2b, bs2b), atol=1e-4, rtol=1e-4)

    print("KERNEL_OK")
</pallas_src>

<mosaic_0001>
module attributes {stable_mosaic.version = 11 : i64} {
  func.func @_bilinear_fast_kernel(%arg0: i32, %arg1: i32, %arg2: memref<8x8x1x128xf32, #tpu.memory_space<vmem>>, %arg3: memref<8x1x1x128xf32, #tpu.memory_space<vmem>>, %arg4: memref<8x8x2x1x128xf32, #tpu.memory_space<vmem>>) attributes {dimension_semantics = [#tpu.dimension_semantics<parallel>, #tpu.dimension_semantics<parallel>], iteration_bounds = array<i64: 1, 1>, scalar_prefetch = 0 : i64, scratch_operands = 0 : i64, tpu.core_type = #tpu.core_type<tc>, window_params = [{transform_indices = @transform_0, window_bounds = array<i64: 8, 8, 1, 128>}, {transform_indices = @transform_1, window_bounds = array<i64: 8, 1, 1, 128>}, {transform_indices = @transform_2, window_bounds = array<i64: 8, 8, 2, 1, 128>}]} {
    %c0 = arith.constant 0 : index
    %c0_0 = arith.constant 0 : index
    %c0_1 = arith.constant 0 : index
    %c0_2 = arith.constant 0 : index
    %0 = vector.load %arg2[%c0, %c0_0, %c0_1, %c0_2] : memref<8x8x1x128xf32, #tpu.memory_space<vmem>>, vector<8x8x1x128xf32>
    %c0_3 = arith.constant 0 : index
    %c0_4 = arith.constant 0 : index
    %c0_5 = arith.constant 0 : index
    %c0_6 = arith.constant 0 : index
    %c0_7 = arith.constant 0 : index
    %1 = vector.load %arg4[%c0_3, %c0_4, %c0_5, %c0_6, %c0_7] : memref<8x8x2x1x128xf32, #tpu.memory_space<vmem>>, vector<8x8x1x1x128xf32>
    %2 = vector.shape_cast %1 : vector<8x8x1x1x128xf32> to vector<8x8x1x128xf32>
    %3 = vector.shape_cast %0 : vector<8x8x1x128xf32> to vector<8x8x1x1x128xf32>
    tpu.vector_store %arg4[%c0_3, %c0_4, %c0_5, %c0_6, %c0_7], %3 {strides = array<i32>} : memref<8x8x2x1x128xf32, #tpu.memory_space<vmem>>, vector<8x8x1x1x128xf32>,
    %4 = vector.extract_strided_slice %0 {offsets = [0, 0, 0, 0], sizes = [8, 7, 1, 128], strides = [1, 1, 1, 1]} : vector<8x8x1x128xf32> to vector<8x7x1x128xf32>
    %5 = vector.extract_strided_slice %0 {offsets = [0, 1, 0, 0], sizes = [8, 7, 1, 128], strides = [1, 1, 1, 1]} : vector<8x8x1x128xf32> to vector<8x7x1x128xf32>
    %6 = arith.addf %4, %5 : vector<8x7x1x128xf32>
    %cst = arith.constant 5.000000e-01 : f32
    %7 = vector.broadcast %cst : f32 to vector<8x7x1x128xf32>
    %8 = arith.mulf %7, %6 : vector<8x7x1x128xf32>
    %c0_8 = arith.constant 0 : index
    %c0_9 = arith.constant 0 : index
    %c1 = arith.constant 1 : index
    %c0_10 = arith.constant 0 : index
    %c0_11 = arith.constant 0 : index
    %9 = vector.load %arg4[%c0_8, %c0_9, %c1, %c0_10, %c0_11] : memref<8x8x2x1x128xf32, #tpu.memory_space<vmem>>, vector<8x7x1x1x128xf32>
    %10 = vector.shape_cast %9 : vector<8x7x1x1x128xf32> to vector<8x7x1x128xf32>
    %11 = vector.shape_cast %8 : vector<8x7x1x128xf32> to vector<8x7x1x1x128xf32>
    tpu.vector_store %arg4[%c0_8, %c0_9, %c1, %c0_10, %c0_11], %11 {strides = array<i32>} : memref<8x8x2x1x128xf32, #tpu.memory_space<vmem>>, vector<8x7x1x1x128xf32>,
    %c0_12 = arith.constant 0 : index
    %c0_13 = arith.constant 0 : index
    %c0_14 = arith.constant 0 : index
    %c0_15 = arith.constant 0 : index
    %12 = vector.load %arg3[%c0_12, %c0_13, %c0_14, %c0_15] : memref<8x1x1x128xf32, #tpu.memory_space<vmem>>, vector<8x1x1x128xf32>
    %c0_i32 = arith.constant 0 : i32
    %13 = arith.cmpi eq, %arg1, %c0_i32 : i32
    %cst_16 = arith.constant 0.000000e+00 : f32
    %14 = vector.broadcast %cst_16 : f32 to vector<8x1x1x128xf32>
    %15 = arith.select %13, %14, %12 : vector<8x1x1x128xf32>
    %16 = vector.extract_strided_slice %0 {offsets = [0, 7, 0, 0], sizes = [8, 1, 1, 128], strides = [1, 1, 1, 1]} : vector<8x8x1x128xf32> to vector<8x1x1x128xf32>
    %17 = arith.addf %16, %15 : vector<8x1x1x128xf32>
    %cst_17 = arith.constant 5.000000e-01 : f32
    %18 = vector.broadcast %cst_17 : f32 to vector<8x1x1x128xf32>
    %19 = arith.mulf %18, %17 : vector<8x1x1x128xf32>
    %c0_18 = arith.constant 0 : index
    %c7 = arith.constant 7 : index
    %c1_19 = arith.constant 1 : index
    %c0_20 = arith.constant 0 : index
    %c0_21 = arith.constant 0 : index
    %20 = vector.load %arg4[%c0_18, %c7, %c1_19, %c0_20, %c0_21] : memref<8x8x2x1x128xf32, #tpu.memory_space<vmem>>, vector<8x1x1x1x128xf32>
    %21 = vector.shape_cast %20 : vector<8x1x1x1x128xf32> to vector<8x1x1x128xf32>
    %22 = vector.shape_cast %19 : vector<8x1x1x128xf32> to vector<8x1x1x1x128xf32>
    tpu.vector_store %arg4[%c0_18, %c7, %c1_19, %c0_20, %c0_21], %22 {strides = array<i32>} : memref<8x8x2x1x128xf32, #tpu.memory_space<vmem>>, vector<8x1x1x1x128xf32>,
    return
  }
  func.func @transform_0(%arg0: i32, %arg1: i32) -> (i32, i32, i32, i32) {
    %c0_i32 = arith.constant 0 : i32
    %c0_i32_0 = arith.constant 0 : i32
    %c0_i32_1 = arith.constant 0 : i32
    return %arg0, %arg1, %c0_i32, %c0_i32_0 : i32, i32, i32, i32
  }
  func.func @transform_1(%arg0: i32, %arg1: i32) -> (i32, i32, i32, i32) {
    %c1_i32 = arith.constant 1 : i32
    %0 = arith.addi %arg1, %c1_i32 : i32
    %c8_i32 = arith.constant 8 : i32
    %1 = arith.muli %0, %c8_i32 : i32
    %c7_i32 = arith.constant 7 : i32
    %2 = arith.minsi %1, %c7_i32 : i32
    %c0_i32 = arith.constant 0 : i32
    %c0_i32_0 = arith.constant 0 : i32
    %c0_i32_1 = arith.constant 0 : i32
    return %arg0, %2, %c0_i32, %c0_i32_0 : i32, i32, i32, i32
  }
  func.func @transform_2(%arg0: i32, %arg1: i32) -> (i32, i32, i32, i32, i32) {
    %c0_i32 = arith.constant 0 : i32
    %c0_i32_0 = arith.constant 0 : i32
    %c0_i32_1 = arith.constant 0 : i32
    %c0_i32_2 = arith.constant 0 : i32
    return %arg0, %arg1, %c0_i32, %c0_i32_0, %c0_i32_1 : i32, i32, i32, i32, i32
  }
}

</mosaic_0001>

<bundles_post_ra>
// kernel: _temporal_upsample_bilinear.1
= control target key start
LH: loop header
LB: loop body
LE: loop exit
PB: predicated region body
PF: predicated region fallthrough
CT: control target
= control target key end

     0   :  { %s1319_s0 = inlined_call_operand.vmem [shape: f32[8,8,1,128], index: 0, kind: input, shape index: {}, may-alias: {0,1}]   ;;  %s1320_s1 = inlined_call_operand.vmem [shape: f32[8,8,1,128], index: 1, kind: input, shape index: {}, may-alias: {0,1}]   ;;  %s1321_s2 = inlined_call_operand.vmem [shape: f32[8,8,2,1,128], index: 2, kind: output, shape index: {}]  }
   0x1   :  { %v91_v0 = vld [vmem:[%s1319_s0] sm:$0x1]  ;;  %v92_v1 = vld [vmem:[%s1319_s0 + $0x1] sm:$0x1]  ;;  %v93_v2 = vld [vmem:[%s1319_s0 + $0x2] sm:$0x1] }
   0x2   :  { %155 = vst [vmem:[%s1321_s2] sm:$0x1] %v91_v0  ;;  %v94_v3 = vld [vmem:[%s1319_s0 + $0x3] sm:$0x1]  ;;  %156 = vst [vmem:[%s1321_s2 + $0x2] sm:$0x1] %v92_v1  ;;  %v678_v25 = vadd.f32 %v92_v1, %v91_v0  ;;  %v699_v29 = vadd.f32 %v93_v2, %v92_v1 }
   0x3   :  { %157 = vst [vmem:[%s1321_s2 + $0x4] sm:$0x1] %v93_v2  ;;  %158 = vst [vmem:[%s1321_s2 + $0x6] sm:$0x1] %v94_v3  ;;  %v95_v4 = vld [vmem:[%s1319_s0 + $0x4] sm:$0x1]  ;;  %v701_v30 = vadd.f32 %v94_v3, %v93_v2 }
   0x4   :  { %v96_v5 = vld [vmem:[%s1319_s0 + $0x5] sm:$0x1]  ;;  %v97_v6 = vld [vmem:[%s1319_s0 + $0x6] sm:$0x1]  ;;  %159 = vst [vmem:[%s1321_s2 + $0x8] sm:$0x1] %v95_v4  ;;  %v703_v31 = vadd.f32 %v95_v4, %v94_v3 }
   0x5   :  { %160 = vst [vmem:[%s1321_s2 + $0xa] sm:$0x1] %v96_v5  ;;  %161 = vst [vmem:[%s1321_s2 + $0xc] sm:$0x1] %v97_v6  ;;  %v574_v7 = vld [vmem:[%s1319_s0 + $0x7] sm:$0x1]  ;;  %v705_v32 = vadd.f32 %v96_v5, %v95_v4  ;;  %v725_v36 = vadd.f32 %v97_v6, %v96_v5 }
   0x6   :  { %1331 = vst [vmem:[#allocation3_spill] sm:$0xff] %v574_v7  ;;  %v99_v8 = vld [vmem:[%s1319_s0 + $0x8] sm:$0x1]  ;;  %v100_v9 = vld [vmem:[%s1319_s0 + $0x9] sm:$0x1]  ;;  %v728_v37 = vadd.f32 %v574_v7, %v97_v6 }
   0x7   :  { %162 = vst [vmem:[%s1321_s2 + $0xe] sm:$0x1] %v574_v7  ;;  %163 = vst [vmem:[%s1321_s2 + $0x10] sm:$0x1] %v99_v8  ;;  %v101_v10 = vld [vmem:[%s1319_s0 + $0xa] sm:$0x1]  ;;  %v730_v38 = vadd.f32 %v100_v9, %v99_v8 }
   0x8   :  { %164 = vst [vmem:[%s1321_s2 + $0x12] sm:$0x1] %v100_v9  ;;  %v102_v11 = vld [vmem:[%s1319_s0 + $0xb] sm:$0x1]  ;;  %v103_v12 = vld [vmem:[%s1319_s0 + $0xc] sm:$0x1]  ;;  %v732_v39 = vadd.f32 %v101_v10, %v100_v9 }
   0x9   :  { %165 = vst [vmem:[%s1321_s2 + $0x14] sm:$0x1] %v101_v10  ;;  %166 = vst [vmem:[%s1321_s2 + $0x16] sm:$0x1] %v102_v11  ;;  %v104_v13 = vld [vmem:[%s1319_s0 + $0xd] sm:$0x1]  ;;  %v754_v43 = vadd.f32 %v102_v11, %v101_v10  ;;  %v756_v44 = vadd.f32 %v103_v12, %v102_v11 }
   0xa   :  { %167 = vst [vmem:[%s1321_s2 + $0x18] sm:$0x1] %v103_v12  ;;  %v105_v14 = vld [vmem:[%s1319_s0 + $0xe] sm:$0x1]  ;;  %v619_v15 = vld [vmem:[%s1319_s0 + $0xf] sm:$0x1]  ;;  %v758_v45 = vadd.f32 %v104_v13, %v103_v12 }
   0xb   :  { %1332 = vst [vmem:[#allocation4_spill] sm:$0xff] %v619_v15  ;;  %168 = vst [vmem:[%s1321_s2 + $0x1a] sm:$0x1] %v104_v13  ;;  %v107_v16 = vld [vmem:[%s1319_s0 + $0x10] sm:$0x1]  ;;  %v760_v46 = vadd.f32 %v105_v14, %v104_v13  ;;  %v782_v50 = vadd.f32 %v619_v15, %v105_v14  ;;  %v281_v7 = vmul.f32 0.5, %v728_v37 }
   0xc   :  { %169 = vst [vmem:[%s1321_s2 + $0x1c] sm:$0x1] %v105_v14  ;;  %170 = vst [vmem:[%s1321_s2 + $0x1e] sm:$0x1] %v619_v15  ;;  %v108_v17 = vld [vmem:[%s1319_s0 + $0x11] sm:$0x1] }
   0xd   :  { %v109_v18 = vld [vmem:[%s1319_s0 + $0x12] sm:$0x1]  ;;  %171 = vst [vmem:[%s1321_s2 + $0x20] sm:$0x1] %v107_v16  ;;  %172 = vst [vmem:[%s1321_s2 + $0x22] sm:$0x1] %v108_v17  ;;  %v784_v51 = vadd.f32 %v108_v17, %v107_v16 }
   0xe   :  { %173 = vst [vmem:[%s1321_s2 + $0x24] sm:$0x1] %v109_v18  ;;  %v110_v19 = vld [vmem:[%s1319_s0 + $0x13] sm:$0x1]  ;;  %v111_v20 = vld [vmem:[%s1319_s0 + $0x14] sm:$0x1]  ;;  %v786_v52 = vadd.f32 %v109_v18, %v108_v17 }
   0xf   :  { %v112_v21 = vld [vmem:[%s1319_s0 + $0x15] sm:$0x1]  ;;  %174 = vst [vmem:[%s1321_s2 + $0x26] sm:$0x1] %v110_v19  ;;  %175 = vst [vmem:[%s1321_s2 + $0x28] sm:$0x1] %v111_v20  ;;  %v788_v53 = vadd.f32 %v110_v19, %v109_v18  ;;  %v810_v57 = vadd.f32 %v111_v20, %v110_v19 }
  0x10   :  { %176 = vst [vmem:[%s1321_s2 + $0x2a] sm:$0x1] %v112_v21  ;;  %v113_v22 = vld [vmem:[%s1319_s0 + $0x16] sm:$0x1]  ;;  %v673_v23 = vld [vmem:[%s1319_s0 + $0x17] sm:$0x1]  ;;  %v812_v58 = vadd.f32 %v112_v21, %v111_v20 }
  0x11   :  { %1333 = vst [vmem:[#allocation5_spill] sm:$0xff] %v673_v23  ;;  %v115_v24 = vld [vmem:[%s1319_s0 + $0x18] sm:$0x1]  ;;  %177 = vst [vmem:[%s1321_s2 + $0x2c] sm:$0x1] %v113_v22  ;;  %v814_v59 = vadd.f32 %v113_v22, %v112_v21  ;;  %v817_v60 = vadd.f32 %v673_v23, %v113_v22  ;;  %v280_v15 = vmul.f32 0.5, %v725_v36 }
  0x12   :  { %178 = vst [vmem:[%s1321_s2 + $0x2e] sm:$0x1] %v673_v23  ;;  %179 = vst [vmem:[%s1321_s2 + $0x30] sm:$0x1] %v115_v24  ;;  %v116_v26 = vld [vmem:[%s1319_s0 + $0x19] sm:$0x1] }
  0x13   :  { %v117_v27 = vld [vmem:[%s1319_s0 + $0x1a] sm:$0x1]  ;;  %v118_v28 = vld [vmem:[%s1319_s0 + $0x1b] sm:$0x1]  ;;  %180 = vst [vmem:[%s1321_s2 + $0x32] sm:$0x1] %v116_v26  ;;  %v838_v0 = vadd.f32 %v116_v26, %v115_v24 }
  0x14   :  { %181 = vst [vmem:[%s1321_s2 + $0x34] sm:$0x1] %v117_v27  ;;  %182 = vst [vmem:[%s1321_s2 + $0x36] sm:$0x1] %v118_v28  ;;  %v119_v33 = vld [vmem:[%s1319_s0 + $0x1c] sm:$0x1]  ;;  %v840_v1 = vadd.f32 %v117_v27, %v116_v26  ;;  %v842_v2 = vadd.f32 %v118_v28, %v117_v27 }
  0x15   :  { %v120_v34 = vld [vmem:[%s1319_s0 + $0x1d] sm:$0x1]  ;;  %v121_v35 = vld [vmem:[%s1319_s0 + $0x1e] sm:$0x1]  ;;  %183 = vst [vmem:[%s1321_s2 + $0x38] sm:$0x1] %v119_v33  ;;  %v844_v3 = vadd.f32 %v119_v33, %v118_v28 }
  0x16   :  { %184 = vst [vmem:[%s1321_s2 + $0x3a] sm:$0x1] %v120_v34  ;;  %185 = vst [vmem:[%s1321_s2 + $0x3c] sm:$0x1] %v121_v35  ;;  %v746_v40 = vld [vmem:[%s1319_s0 + $0x1f] sm:$0x1]  ;;  %v864_v8 = vadd.f32 %v120_v34, %v119_v33  ;;  %v866_v9 = vadd.f32 %v121_v35, %v120_v34 }
  0x17   :  { %1334 = vst [vmem:[#allocation6_spill] sm:$0xff] %v746_v40  ;;  %v123_v41 = vld [vmem:[%s1319_s0 + $0x20] sm:$0x1]  ;;  %v124_v42 = vld [vmem:[%s1319_s0 + $0x21] sm:$0x1]  ;;  %v869_v10 = vadd.f32 %v746_v40, %v121_v35  ;;  %v279_v23 = vmul.f32 0.5, %v705_v32 }
  0x18   :  { %186 = vst [vmem:[%s1321_s2 + $0x3e] sm:$0x1] %v746_v40  ;;  %187 = vst [vmem:[%s1321_s2 + $0x40] sm:$0x1] %v123_v41  ;;  %v125_v47 = vld [vmem:[%s1319_s0 + $0x22] sm:$0x1]  ;;  %v871_v11 = vadd.f32 %v124_v42, %v123_v41 }
  0x19   :  { %188 = vst [vmem:[%s1321_s2 + $0x42] sm:$0x1] %v124_v42  ;;  %v126_v48 = vld [vmem:[%s1319_s0 + $0x23] sm:$0x1]  ;;  %v127_v49 = vld [vmem:[%s1319_s0 + $0x24] sm:$0x1]  ;;  %v893_v16 = vadd.f32 %v125_v47, %v124_v42 }
  0x1a   :  { %189 = vst [vmem:[%s1321_s2 + $0x44] sm:$0x1] %v125_v47  ;;  %190 = vst [vmem:[%s1321_s2 + $0x46] sm:$0x1] %v126_v48  ;;  %v128_v54 = vld [vmem:[%s1319_s0 + $0x25] sm:$0x1]  ;;  %v895_v17 = vadd.f32 %v126_v48, %v125_v47  ;;  %v897_v18 = vadd.f32 %v127_v49, %v126_v48 }
  0x1b   :  { %191 = vst [vmem:[%s1321_s2 + $0x48] sm:$0x1] %v127_v49  ;;  %v129_v55 = vld [vmem:[%s1319_s0 + $0x26] sm:$0x1]  ;;  %v808_v56 = vld [vmem:[%s1319_s0 + $0x27] sm:$0x1]  ;;  %v899_v19 = vadd.f32 %v128_v54, %v127_v49 }
  0x1c   :  { %1335 = vst [vmem:[#allocation7_spill] sm:$0xff] %v808_v56  ;;  %192 = vst [vmem:[%s1321_s2 + $0x4a] sm:$0x1] %v128_v54  ;;  %v131_v61 = vld [vmem:[%s1319_s0 + $0x28] sm:$0x1]  ;;  %v920_v24 = vadd.f32 %v129_v55, %v128_v54  ;;  %v923_v26 = vadd.f32 %v808_v56, %v129_v55  ;;  %v287_v32 = vmul.f32 0.5, %v760_v46 }
  0x1d   :  { %193 = vst [vmem:[%s1321_s2 + $0x4c] sm:$0x1] %v129_v55  ;;  %194 = vst [vmem:[%s1321_s2 + $0x4e] sm:$0x1] %v808_v56  ;;  %v132_v62 = vld [vmem:[%s1319_s0 + $0x29] sm:$0x1] }
  0x1e   :  { %v133_v63 = vld [vmem:[%s1319_s0 + $0x2a] sm:$0x1]  ;;  %195 = vst [vmem:[%s1321_s2 + $0x50] sm:$0x1] %v131_v61  ;;  %196 = vst [vmem:[%s1321_s2 + $0x52] sm:$0x1] %v132_v62  ;;  %v925_v27 = vadd.f32 %v132_v62, %v131_v61 }
  0x1f   :  { %197 = vst [vmem:[%s1321_s2 + $0x54] sm:$0x1] %v133_v63  ;;  %v134_v4 = vld [vmem:[%s1319_s0 + $0x2b] sm:$0x1]  ;;  %v135_v5 = vld [vmem:[%s1319_s0 + $0x2c] sm:$0x1]  ;;  %v927_v28 = vadd.f32 %v133_v63, %v132_v62 }
  0x20   :  { %v136_v6 = vld [vmem:[%s1319_s0 + $0x2d] sm:$0x1]  ;;  %198 = vst [vmem:[%s1321_s2 + $0x56] sm:$0x1] %v134_v4  ;;  %199 = vst [vmem:[%s1321_s2 + $0x58] sm:$0x1] %v135_v5  ;;  %v947_v41 = vadd.f32 %v134_v4, %v133_v63  ;;  %v949_v42 = vadd.f32 %v135_v5, %v134_v4 }
  0x21   :  { %200 = vst [vmem:[%s1321_s2 + $0x5a] sm:$0x1] %v136_v6  ;;  %v137_v12 = vld [vmem:[%s1319_s0 + $0x2e] sm:$0x1]  ;;  %v888_v13 = vld [vmem:[%s1319_s0 + $0x2f] sm:$0x1]  ;;  %v951_v47 = vadd.f32 %v136_v6, %v135_v5 }
  0x22   :  { %1336 = vst [vmem:[#allocation8_spill] sm:$0xff] %v888_v13  ;;  %v139_v14 = vld [vmem:[%s1319_s0 + $0x30] sm:$0x1]  ;;  %201 = vst [vmem:[%s1321_s2 + $0x5c] sm:$0x1] %v137_v12  ;;  %v953_v48 = vadd.f32 %v137_v12, %v136_v6  ;;  %v976_v61 = vadd.f32 %v888_v13, %v137_v12  ;;  %v288_v36 = vmul.f32 0.5, %v782_v50 }
  0x23   :  { %202 = vst [vmem:[%s1321_s2 + $0x5e] sm:$0x1] %v888_v13  ;;  %203 = vst [vmem:[%s1321_s2 + $0x60] sm:$0x1] %v139_v14  ;;  %v140_v20 = vld [vmem:[%s1319_s0 + $0x31] sm:$0x1] }
  0x24   :  { %v141_v21 = vld [vmem:[%s1319_s0 + $0x32] sm:$0x1]  ;;  %v142_v22 = vld [vmem:[%s1319_s0 + $0x33] sm:$0x1]  ;;  %204 = vst [vmem:[%s1321_s2 + $0x62] sm:$0x1] %v140_v20  ;;  %v978_v62 = vadd.f32 %v140_v20, %v139_v14 }
  0x25   :  { %205 = vst [vmem:[%s1321_s2 + $0x64] sm:$0x1] %v141_v21  ;;  %206 = vst [vmem:[%s1321_s2 + $0x66] sm:$0x1] %v142_v22  ;;  %v143_v33 = vld [vmem:[%s1319_s0 + $0x34] sm:$0x1]  ;;  %v980_v63 = vadd.f32 %v141_v21, %v140_v20  ;;  %v982_v4 = vadd.f32 %v142_v22, %v141_v21 }
  0x26   :  { %v144_v34 = vld [vmem:[%s1319_s0 + $0x35] sm:$0x1]  ;;  %v145_v35 = vld [vmem:[%s1319_s0 + $0x36] sm:$0x1]  ;;  %207 = vst [vmem:[%s1321_s2 + $0x68] sm:$0x1] %v143_v33  ;;  %v1005_v14 = vadd.f32 %v143_v33, %v142_v22 }
  0x27   :  { %208 = vst [vmem:[%s1321_s2 + $0x6a] sm:$0x1] %v144_v34  ;;  %209 = vst [vmem:[%s1321_s2 + $0x6c] sm:$0x1] %v145_v35  ;;  %v967_v49 = vld [vmem:[%s1319_s0 + $0x37] sm:$0x1]  ;;  %v1007_v20 = vadd.f32 %v144_v34, %v143_v33  ;;  %v1009_v21 = vadd.f32 %v145_v35, %v144_v34 }
  0x28   :  { %1337 = vst [vmem:[#allocation9_spill] sm:$0xff] %v967_v49  ;;  %v147_v54 = vld [vmem:[%s1319_s0 + $0x38] sm:$0x1]  ;;  %v148_v55 = vld [vmem:[%s1319_s0 + $0x39] sm:$0x1]  ;;  %v1012_v13 = vadd.f32 %v967_v49, %v145_v35  ;;  %v289_v37 = vmul.f32 0.5, %v784_v51 }
  0x29   :  { %210 = vst [vmem:[%s1321_s2 + $0x6e] sm:$0x1] %v967_v49  ;;  %211 = vst [vmem:[%s1321_s2 + $0x70] sm:$0x1] %v147_v54  ;;  %v149_v5 = vld [vmem:[%s1319_s0 + $0x3a] sm:$0x1]  ;;  %v1039_v35 = vadd.f32 %v148_v55, %v147_v54 }
  0x2a   :  { %212 = vst [vmem:[%s1321_s2 + $0x72] sm:$0x1] %v148_v55  ;;  %v150_v6 = vld [vmem:[%s1319_s0 + $0x3b] sm:$0x1]  ;;  %v1003_v12 = vld [vmem:[%s1319_s0 + $0x3c] sm:$0x1]  ;;  %v1041_v49 = vadd.f32 %v149_v5, %v148_v55 }
  0x2b   :  { %213 = vst [vmem:[%s1321_s2 + $0x74] sm:$0x1] %v149_v5  ;;  %214 = vst [vmem:[%s1321_s2 + $0x76] sm:$0x1] %v150_v6  ;;  %v1027_v22 = vld [vmem:[%s1319_s0 + $0x3d] sm:$0x1]  ;;  %v1043_v56 = vadd.f32 %v150_v6, %v149_v5  ;;  %v1046_v40 = vadd.f32 %v1003_v12, %v150_v6 }
  0x2c   :  { %215 = vst [vmem:[%s1321_s2 + $0x78] sm:$0x1] %v1003_v12  ;;  %v1032_v33 = vld [vmem:[%s1319_s0 + $0x3e] sm:$0x1]  ;;  %v1037_v34 = vld [vmem:[%s1319_s0 + $0x3f] sm:$0x1] }
  0x2d   :  { %1338 = vst [vmem:[#allocation10_spill] sm:$0xff] %v1032_v33  ;;  %216 = vst [vmem:[%s1321_s2 + $0x7a] sm:$0x1] %v1027_v22  ;;  %v275_v54 = vmul.f32 0.5, %v678_v25  ;;  %v276_v55 = vmul.f32 0.5, %v699_v29  ;;  %v277_v5 = vmul.f32 0.5, %v701_v30 }
  0x2e   :  { %217 = vst [vmem:[%s1321_s2 + $0x7c] sm:$0x1] %v1032_v33  ;;  %218 = vst [vmem:[%s1321_s2 + $0x7e] sm:$0x1] %v1037_v34  ;;  %v278_v6 = vmul.f32 0.5, %v703_v31  ;;  %v282_v33 = vmul.f32 0.5, %v730_v38 }
  0x2f   :  { %450 = vst [vmem:[%s1321_s2 + $0x1] sm:$0x1] %v275_v54  ;;  %451 = vst [vmem:[%s1321_s2 + $0x3] sm:$0x1] %v276_v55  ;;  %v283_v25 = vmul.f32 0.5, %v732_v39  ;;  %v284_v29 = vmul.f32 0.5, %v754_v43 }
  0x30   :  { %452 = vst [vmem:[%s1321_s2 + $0x5] sm:$0x1] %v277_v5  ;;  %453 = vst [vmem:[%s1321_s2 + $0x7] sm:$0x1] %v278_v6  ;;  %v285_v30 = vmul.f32 0.5, %v756_v44  ;;  %v286_v31 = vmul.f32 0.5, %v758_v45 }
  0x31   :  { %454 = vst [vmem:[%s1321_s2 + $0x9] sm:$0x1] %v279_v23  ;;  %455 = vst [vmem:[%s1321_s2 + $0xb] sm:$0x1] %v280_v15  ;;  %v290_v23 = vmul.f32 0.5, %v786_v52  ;;  %v292_v15 = vmul.f32 0.5, %v810_v57 }
  0x32   :  { %456 = vst [vmem:[%s1321_s2 + $0xd] sm:$0x1] %v281_v7  ;;  %457 = vst [vmem:[%s1321_s2 + $0x11] sm:$0x1] %v282_v33  ;;  %v291_v7 = vmul.f32 0.5, %v788_v53  ;;  %v293_v38 = vmul.f32 0.5, %v812_v58 }
  0x33   :  { %458 = vst [vmem:[%s1321_s2 + $0x13] sm:$0x1] %v283_v25  ;;  %459 = vst [vmem:[%s1321_s2 + $0x15] sm:$0x1] %v284_v29  ;;  %v294_v39 = vmul.f32 0.5, %v814_v59  ;;  %v295_v43 = vmul.f32 0.5, %v817_v60 }
  0x34   :  { %460 = vst [vmem:[%s1321_s2 + $0x17] sm:$0x1] %v285_v30  ;;  %461 = vst [vmem:[%s1321_s2 + $0x19] sm:$0x1] %v286_v31  ;;  %v296_v44 = vmul.f32 0.5, %v838_v0  ;;  %v297_v45 = vmul.f32 0.5, %v840_v1 }
  0x35   :  { %462 = vst [vmem:[%s1321_s2 + $0x1b] sm:$0x1] %v287_v32  ;;  %463 = vst [vmem:[%s1321_s2 + $0x1d] sm:$0x1] %v288_v36  ;;  %v298_v46 = vmul.f32 0.5, %v842_v2  ;;  %v299_v50 = vmul.f32 0.5, %v844_v3 }
  0x36   :  { %464 = vst [vmem:[%s1321_s2 + $0x21] sm:$0x1] %v289_v37  ;;  %465 = vst [vmem:[%s1321_s2 + $0x23] sm:$0x1] %v290_v23  ;;  %v300_v51 = vmul.f32 0.5, %v864_v8  ;;  %v301_v52 = vmul.f32 0.5, %v866_v9 }
  0x37   :  { %466 = vst [vmem:[%s1321_s2 + $0x25] sm:$0x1] %v291_v7  ;;  %467 = vst [vmem:[%s1321_s2 + $0x27] sm:$0x1] %v292_v15  ;;  %v302_v53 = vmul.f32 0.5, %v869_v10  ;;  %v303_v57 = vmul.f32 0.5, %v871_v11 }
  0x38   :  { %468 = vst [vmem:[%s1321_s2 + $0x29] sm:$0x1] %v293_v38  ;;  %469 = vst [vmem:[%s1321_s2 + $0x2b] sm:$0x1] %v294_v39  ;;  %v304_v58 = vmul.f32 0.5, %v893_v16  ;;  %v305_v59 = vmul.f32 0.5, %v895_v17 }
  0x39   :  { %470 = vst [vmem:[%s1321_s2 + $0x2d] sm:$0x1] %v295_v43  ;;  %471 = vst [vmem:[%s1321_s2 + $0x31] sm:$0x1] %v296_v44  ;;  %v306_v60 = vmul.f32 0.5, %v897_v18  ;;  %v307_v0 = vmul.f32 0.5, %v899_v19 }
  0x3a   :  { %472 = vst [vmem:[%s1321_s2 + $0x33] sm:$0x1] %v297_v45  ;;  %473 = vst [vmem:[%s1321_s2 + $0x35] sm:$0x1] %v298_v46  ;;  %v308_v1 = vmul.f32 0.5, %v920_v24  ;;  %v309_v2 = vmul.f32 0.5, %v923_v26 }
  0x3b   :  { %474 = vst [vmem:[%s1321_s2 + $0x37] sm:$0x1] %v299_v50  ;;  %475 = vst [vmem:[%s1321_s2 + $0x39] sm:$0x1] %v300_v51  ;;  %v310_v3 = vmul.f32 0.5, %v925_v27  ;;  %v311_v8 = vmul.f32 0.5, %v927_v28 }
  0x3c   :  { %476 = vst [vmem:[%s1321_s2 + $0x3b] sm:$0x1] %v301_v52  ;;  %477 = vst [vmem:[%s1321_s2 + $0x3d] sm:$0x1] %v302_v53  ;;  %v312_v9 = vmul.f32 0.5, %v947_v41  ;;  %v313_v10 = vmul.f32 0.5, %v949_v42 }
  0x3d   :  { %478 = vst [vmem:[%s1321_s2 + $0x41] sm:$0x1] %v303_v57  ;;  %479 = vst [vmem:[%s1321_s2 + $0x43] sm:$0x1] %v304_v58  ;;  %v314_v11 = vmul.f32 0.5, %v951_v47  ;;  %v315_v16 = vmul.f32 0.5, %v953_v48 }
  0x3e   :  { %480 = vst [vmem:[%s1321_s2 + $0x45] sm:$0x1] %v305_v59  ;;  %481 = vst [vmem:[%s1321_s2 + $0x47] sm:$0x1] %v306_v60  ;;  %v316_v17 = vmul.f32 0.5, %v976_v61  ;;  %v317_v18 = vmul.f32 0.5, %v978_v62 }
  0x3f   :  { %482 = vst [vmem:[%s1321_s2 + $0x49] sm:$0x1] %v307_v0  ;;  %483 = vst [vmem:[%s1321_s2 + $0x4b] sm:$0x1] %v308_v1  ;;  %v318_v19 = vmul.f32 0.5, %v980_v63  ;;  %v319_v24 = vmul.f32 0.5, %v982_v4 }
  0x40   :  { %484 = vst [vmem:[%s1321_s2 + $0x4d] sm:$0x1] %v309_v2  ;;  %485 = vst [vmem:[%s1321_s2 + $0x51] sm:$0x1] %v310_v3  ;;  %v320_v26 = vmul.f32 0.5, %v1005_v14  ;;  %v321_v27 = vmul.f32 0.5, %v1007_v20 }
  0x41   :  { %486 = vst [vmem:[%s1321_s2 + $0x53] sm:$0x1] %v311_v8  ;;  %487 = vst [vmem:[%s1321_s2 + $0x55] sm:$0x1] %v312_v9  ;;  %v322_v28 = vmul.f32 0.5, %v1009_v21  ;;  %v323_v41 = vmul.f32 0.5, %v1012_v13 }
  0x42   :  { %488 = vst [vmem:[%s1321_s2 + $0x57] sm:$0x1] %v313_v10  ;;  %489 = vst [vmem:[%s1321_s2 + $0x59] sm:$0x1] %v314_v11  ;;  %v324_v42 = vmul.f32 0.5, %v1039_v35  ;;  %v325_v47 = vmul.f32 0.5, %v1041_v49 }
  0x43   :  { %490 = vst [vmem:[%s1321_s2 + $0x5b] sm:$0x1] %v315_v16  ;;  %491 = vst [vmem:[%s1321_s2 + $0x5d] sm:$0x1] %v316_v17  ;;  %v326_v48 = vmul.f32 0.5, %v1043_v56  ;;  %v327_v13 = vmul.f32 0.5, %v1046_v40  ;;  %v272_v56 = vadd.f32 %v1027_v22, %v1003_v12 }
  0x44   :  { %492 = vst [vmem:[%s1321_s2 + $0x61] sm:$0x1] %v317_v18  ;;  %493 = vst [vmem:[%s1321_s2 + $0x63] sm:$0x1] %v318_v19  ;;  %v1339_v49 = vld [vmem:[#allocation10_spill] sm:$0xff]  ;;  %v1340_v40 = vld [vmem:[#allocation3_spill] sm:$0xff] }
  0x45   :  { %494 = vst [vmem:[%s1321_s2 + $0x65] sm:$0x1] %v319_v24  ;;  %495 = vst [vmem:[%s1321_s2 + $0x67] sm:$0x1] %v320_v26  ;;  %v273_v61 = vadd.f32 %v1339_v49, %v1027_v22  ;;  %v274_v62 = vadd.f32 %v1037_v34, %v1339_v49  ;;  %v416_v63 = vmul.f32 0.5, %v1340_v40  ;;  %v1341_v4 = vld [vmem:[#allocation4_spill] sm:$0xff] }
  0x46   :  { %496 = vst [vmem:[%s1321_s2 + $0x69] sm:$0x1] %v321_v27  ;;  %497 = vst [vmem:[%s1321_s2 + $0x6b] sm:$0x1] %v322_v28  ;;  %v417_v12 = vmul.f32 0.5, %v1341_v4  ;;  %v1342_v14 = vld [vmem:[#allocation5_spill] sm:$0xff] }
  0x47   :  { %498 = vst [vmem:[%s1321_s2 + $0x6d] sm:$0x1] %v323_v41  ;;  %499 = vst [vmem:[%s1321_s2 + $0x71] sm:$0x1] %v324_v42  ;;  %v418_v20 = vmul.f32 0.5, %v1342_v14  ;;  %v1343_v21 = vld [vmem:[#allocation6_spill] sm:$0xff] }
  0x48   :  { %500 = vst [vmem:[%s1321_s2 + $0x73] sm:$0x1] %v325_v47  ;;  %501 = vst [vmem:[%s1321_s2 + $0x75] sm:$0x1] %v326_v48  ;;  %v419_v22 = vmul.f32 0.5, %v1343_v21  ;;  %v328_v33 = vmul.f32 0.5, %v272_v56 }
  0x49   :  { %502 = vst [vmem:[%s1321_s2 + $0x77] sm:$0x1] %v327_v13  ;;  %v329_v35 = vmul.f32 0.5, %v273_v61  ;;  %v330_v54 = vmul.f32 0.5, %v274_v62  ;;  %v1344_v55 = vld [vmem:[#allocation7_spill] sm:$0xff]  ;;  %v1345_v6 = vld [vmem:[#allocation8_spill] sm:$0xff] }
  0x4a   :  { %v420_v5 = vmul.f32 0.5, %v1344_v55  ;;  %506 = vst [vmem:[%s1321_s2 + $0xf] sm:$0x1] %v416_v63  ;;  %507 = vst [vmem:[%s1321_s2 + $0x1f] sm:$0x1] %v417_v12  ;;  %v421_v25 = vmul.f32 0.5, %v1345_v6 }
  0x4b   :  { %508 = vst [vmem:[%s1321_s2 + $0x2f] sm:$0x1] %v418_v20  ;;  %509 = vst [vmem:[%s1321_s2 + $0x3f] sm:$0x1] %v419_v22  ;;  %v1346_v29 = vld [vmem:[#allocation9_spill] sm:$0xff]  ;;  %v423_v31 = vmul.f32 0.5, %v1037_v34 }
  0x4c   :  { %v422_v30 = vmul.f32 0.5, %v1346_v29  ;;  %503 = vst [vmem:[%s1321_s2 + $0x79] sm:$0x1] %v328_v33  ;;  %504 = vst [vmem:[%s1321_s2 + $0x7b] sm:$0x1] %v329_v35 }
  0x4d   :  { %505 = vst [vmem:[%s1321_s2 + $0x7d] sm:$0x1] %v330_v54  ;;  %510 = vst [vmem:[%s1321_s2 + $0x4f] sm:$0x1] %v420_v5 }
  0x4e   :  { %511 = vst [vmem:[%s1321_s2 + $0x5f] sm:$0x1] %v421_v25  ;;  %512 = vst [vmem:[%s1321_s2 + $0x6f] sm:$0x1] %v422_v30 }
  0x4f   :  { %513 = vst [vmem:[%s1321_s2 + $0x7f] sm:$0x1] %v423_v31 }

</bundles_post_ra>
